<compile_context>
chip_gen: v7x
topology: tpu7x:2x2x1
jax: 0.10.0
libtpu: 0.0.40
codegen_flags: <defaults>
</compile_context>

<pallas_src>
import jax
import jax.numpy as jnp
from jax.experimental import pallas as pl
from jax.experimental.pallas import tpu as pltpu

_LANES = 128                 # complex elements per row == output lanes per row
_IN_LANES = 2 * _LANES       # interleaved f32 lanes per row (re, im, re, im, ...)
_MAX_BLOCK_ROWS_1TC = 1024   # 1 MiB in + 0.5 MiB out per block (v5e/v6e sweet spot)
_MAX_BLOCK_ROWS_2TC = 2048   # v7x: larger blocks to amortize ~0.35us/step vs 3.2 TB/s HBM


def _two_tensorcores():
    """True on chips with 2 TensorCores per chip (v7x-style megacore)."""
    try:
        d = jax.devices()[0]
        if int(getattr(d, "num_cores", 1) or 1) > 1:
            return True
        kind = str(getattr(d, "device_kind", "")).lower()
        return ("v7" in kind) or ("7x" in kind)
    except Exception:
        return False


def _roll_lanes_left(a, s):
    """result[..., l] = a[..., (l + s) % L].

    pltpu.roll follows jnp.roll semantics, so a left rotation by s is a roll by
    (L - s); expressed with a non-negative shift.  Single-vreg XLU lane rotate —
    no lane-slice concatenates, no VMEM temporaries."""
    L = a.shape[-1]
    return pltpu.roll(a, (L - s) % L, axis=a.ndim - 1)


def _compact_half(h):
    """h: (BR, 128) f32 with lanes alternating (re, im).

    Returns (BR, 128) where lanes 0..63 hold the 64 imag values in order
    (lanes 64..127 are junk).  log2(64)=6-stage rotate+select butterfly; every
    roll stays inside one 128-lane vreg column, every select is a VPU op."""
    L = h.shape[-1]                               # 128
    n_stages = (L // 2).bit_length() - 1          # log2(64) = 6
    lane = jax.lax.broadcasted_iota(jnp.int32, (1, L), 1)
    a = _roll_lanes_left(h, 1)                    # imag(j) now sits at lane 2j
    # Invariant after stage k: every block of 2^(k+1) lanes holds 2^k
    # consecutive imag values (in order) in its first 2^k lanes.
    for k in range(1, n_stages + 1):
        b = _roll_lanes_left(a, 1 << (k - 1))
        take_b = ((lane >> (k - 1)) & 3) == 1
        a = jnp.where(take_b, b, a)
    return a


def _imag_kernel(x_ref, o_ref):
    """x_ref: (BR, 256) f32 interleaved re/im.  o_ref: (BR, 128) f32 imag."""
    v = x_ref[...]
    out_lanes = v.shape[-1] // 2                  # 128
    q = out_lanes // 2                            # 64 imag values per half
    # Vreg-aligned lane split (no data movement), then per-half compaction so
    # every rotate is a single-vreg XLU op.
    lo = _compact_half(v[:, :out_lanes])          # imag(0..63)   in lanes 0..63
    hi = _compact_half(v[:, out_lanes:])          # imag(64..127) in lanes 0..63
    lane = jax.lax.broadcasted_iota(jnp.int32, (1, out_lanes), 1)
    o_ref[...] = jnp.where(lane < q, lo, pltpu.roll(hi, q, axis=1))


def _zeros_kernel(o_ref):
    o_ref[...] = jnp.zeros_like(o_ref)


def _pick_block_rows(rows, two_tc):
    """Rows per block: multiple of 8 (f32 sublanes) unless the whole array is
    smaller; big blocks to amortize per-step overhead; on 2-TC chips keep at
    least 2 grid steps so both TensorCores get work."""
    if rows <= 8:
        return max(rows, 1)
    cap = _MAX_BLOCK_ROWS_2TC if two_tc else _MAX_BLOCK_ROWS_1TC
    br = min(cap, rows)
    if two_tc:
        br = min(br, -(-rows // 2))
    return max((br // 8) * 8, 8)


def _deinterleave_imag_rows(xin):
    """xin: (rows, 256) f32 interleaved (re, im) pairs -> (rows, 128) f32 imag."""
    rows = int(xin.shape[0])
    br = _pick_block_rows(rows, _two_tensorcores())
    return pl.pallas_call(
        _imag_kernel,
        out_shape=jax.ShapeDtypeStruct((rows, _LANES), jnp.float32),
        grid=(pl.cdiv(rows, br),),
        in_specs=[pl.BlockSpec((br, _IN_LANES), lambda i: (i, 0))],
        out_specs=pl.BlockSpec((br, _LANES), lambda i: (i, 0)),
        compiler_params=pltpu.CompilerParams(
            dimension_semantics=("parallel",),
        ),
    )(xin)


def _as_interleaved_f32(x):
    """Bit-reinterpret complex64 as float32 (re, im) pairs, or None if XLA
    refuses the complex bitcast (no arithmetic, no extra HBM pass when it works)."""
    try:
        xf = jax.lax.bitcast_convert_type(x, jnp.float32)
        if xf.shape != x.shape + (2,):
            return None
        return xf
    except Exception:
        return None


def pallas_imag(x):
    """Imaginary part of a complex64 array via a Pallas TPU kernel."""
    if x.dtype != jnp.complex64:
        # TODO(synk): complex128 would need f64 tiles (poor TPU support); use XLA.
        return jnp.imag(x)

    n = int(x.size)
    if n == 0:
        return jnp.zeros(x.shape, jnp.float32)

    xf = _as_interleaved_f32(x)
    if xf is None:
        # TODO(synk): XLA cannot bitcast complex64 to raw f32 bytes here, so there
        # is no zero-copy way to hand the buffer to Pallas; materializing an
        # interleaved copy just to deinterleave it in-kernel costs ~2.3x the HBM
        # traffic of XLA's native imag, so fall back to jnp.imag directly.
        return jnp.imag(x)

    flat = xf.reshape(-1)                    # re0, im0, re1, im1, ...
    rows = -(-n // _LANES)                   # ceil(n / 128)
    pad = rows * _IN_LANES - 2 * n           # only the n % 128 lane tail
    if pad:
        flat = jnp.pad(flat, (0, pad))
    out = _deinterleave_imag_rows(flat.reshape(rows, _IN_LANES))

    if rows * _LANES != n:                   # rare ragged path only
        out = out.reshape(-1)[:n]
    return out.reshape(x.shape)


_SUBLANES_FOR_ITEMSIZE = {8: 8, 4: 8, 2: 16, 1: 32}


def pallas_zeros_like(x):
    """zeros_like(x) written by a (no-input) Pallas fill kernel."""
    total = int(x.size)
    if total == 0 or total % _LANES != 0 or jnp.issubdtype(x.dtype, jnp.complexfloating):
        # TODO(synk): ragged sizes would need masked stores; plain XLA fill.
        return jnp.zeros_like(x)
    itemsize = jnp.dtype(x.dtype).itemsize
    sub = _SUBLANES_FOR_ITEMSIZE.get(itemsize, 8)
    rows = total // _LANES
    if rows <= sub:
        br = rows                            # single full-extent block (legal)
    else:
        br = min(2048, (rows // sub) * sub)  # big sublane-multiple blocks, cdiv grid
    out = pl.pallas_call(
        _zeros_kernel,
        out_shape=jax.ShapeDtypeStruct((rows, _LANES), x.dtype),
        grid=(pl.cdiv(rows, br),),
        out_specs=pl.BlockSpec((br, _LANES), lambda i: (i, 0)),
        compiler_params=pltpu.CompilerParams(
            dimension_semantics=("parallel",),
        ),
    )()
    return out.reshape(x.shape)


class Imag:
    """Pallas mirror of the torch `Imag` module."""

    def __init__(self, *, return_zeros: bool = False) -> None:
        self.return_zeros = return_zeros

    def __call__(self, x):
        x = jnp.asarray(x)
        if jnp.issubdtype(x.dtype, jnp.complexfloating):
            return pallas_imag(x)
        if self.return_zeros:
            return pallas_zeros_like(x)
        raise RuntimeError(
            "imag is not implemented for tensors with non-complex dtypes."
        )

    forward = __call__


if __name__ == "__main__":
    key = jax.random.PRNGKey(0)
    k_re, k_im, k_dre, k_dim, k_real = jax.random.split(key, 5)

    # Complex NCHW-like activation: batch=2, channels=4, spatial 16x16.
    shape = (2, 4, 16, 16)
    x = (jax.random.normal(k_re, shape, jnp.float32)
         + 1j * jax.random.normal(k_im, shape, jnp.float32)).astype(jnp.complex64)

    mod = Imag()
    y = jax.block_until_ready(mod(x))
    ref = jnp.imag(x)
    assert y.shape == shape and y.dtype == jnp.float32, (y.shape, y.dtype)
    assert bool(jnp.array_equal(y, ref))

    # Directly exercise the Pallas deinterleave kernel on an explicitly built
    # interleaved (rows, 256) buffer (guarantees the kernel compiles & runs on
    # TPU regardless of whether XLA allows the complex->f32 bitcast).
    rows_t = 32
    re_t = jax.random.normal(k_dre, (rows_t, _LANES), jnp.float32)
    im_t = jax.random.normal(k_dim, (rows_t, _LANES), jnp.float32)
    inter = jnp.stack([re_t, im_t], axis=-1).reshape(rows_t, _IN_LANES)
    imag_rows = jax.block_until_ready(_deinterleave_imag_rows(inter))
    assert imag_rows.shape == (rows_t, _LANES) and imag_rows.dtype == jnp.float32
    assert bool(jnp.array_equal(imag_rows, im_t))

    # return_zeros=True with a real (non-complex) input -> zeros of same shape/dtype.
    xr = jax.random.normal(k_real, shape, jnp.float32)
    z = jax.block_until_ready(Imag(return_zeros=True)(xr))
    assert z.shape == shape and z.dtype == jnp.float32
    assert bool(jnp.array_equal(z, jnp.zeros_like(xr)))

    # return_zeros=False with a real input must raise, like torch.
    raised = False
    try:
        Imag()(xr)
    except RuntimeError:
        raised = True
    assert raised

    print("KERNEL_OK")
</pallas_src>

<mosaic_0001>
module attributes {stable_mosaic.version = 11 : i64} {
  func.func @_imag_kernel(%arg0: i32, %arg1: memref<32x256xf32, #tpu.memory_space<vmem>>, %arg2: memref<32x128xf32, #tpu.memory_space<vmem>>) attributes {dimension_semantics = [#tpu.dimension_semantics<parallel>], iteration_bounds = array<i64: 1>, scalar_prefetch = 0 : i64, scratch_operands = 0 : i64, tpu.core_type = #tpu.core_type<tc>, window_params = [{transform_indices = @transform_0, window_bounds = array<i64: 32, 256>}, {transform_indices = @transform_1, window_bounds = array<i64: 32, 128>}]} {
    %c0 = arith.constant 0 : index
    %c0_0 = arith.constant 0 : index
    %0 = vector.load %arg1[%c0, %c0_0] : memref<32x256xf32, #tpu.memory_space<vmem>>, vector<32x256xf32>
    %1 = vector.extract_strided_slice %0 {offsets = [0, 0], sizes = [32, 128], strides = [1, 1]} : vector<32x256xf32> to vector<32x128xf32>
    %2 = tpu.iota {dimensions = array<i32: 1>} : vector<1x128xi32>
    %c127_i32 = arith.constant 127 : i32
    %3 = tpu.dynamic_rotate %1 by %c127_i32 dim 1 : vector<32x128xf32>, i32 -> vector<32x128xf32>
    %c127_i32_1 = arith.constant 127 : i32
    %4 = tpu.dynamic_rotate %3 by %c127_i32_1 dim 1 : vector<32x128xf32>, i32 -> vector<32x128xf32>
    %c0_i32 = arith.constant 0 : i32
    %5 = vector.broadcast %c0_i32 : i32 to vector<1x128xi32>
    %6 = arith.shrsi %2, %5 : vector<1x128xi32>
    %c3_i32 = arith.constant 3 : i32
    %7 = vector.broadcast %c3_i32 : i32 to vector<1x128xi32>
    %8 = arith.andi %6, %7 : vector<1x128xi32>
    %c1_i32 = arith.constant 1 : i32
    %9 = vector.broadcast %c1_i32 : i32 to vector<1x128xi32>
    %10 = arith.cmpi eq, %8, %9 : vector<1x128xi32>
    %11 = vector.shape_cast %10 : vector<1x128xi1> to vector<1x128xi1>
    %12 = vector.broadcast %11 : vector<1x128xi1> to vector<32x128xi1>
    %13 = arith.select %12, %4, %3 : vector<32x128xi1>, vector<32x128xf32>
    %c126_i32 = arith.constant 126 : i32
    %14 = tpu.dynamic_rotate %13 by %c126_i32 dim 1 : vector<32x128xf32>, i32 -> vector<32x128xf32>
    %c1_i32_2 = arith.constant 1 : i32
    %15 = vector.broadcast %c1_i32_2 : i32 to vector<1x128xi32>
    %16 = arith.shrsi %2, %15 : vector<1x128xi32>
    %c3_i32_3 = arith.constant 3 : i32
    %17 = vector.broadcast %c3_i32_3 : i32 to vector<1x128xi32>
    %18 = arith.andi %16, %17 : vector<1x128xi32>
    %c1_i32_4 = arith.constant 1 : i32
    %19 = vector.broadcast %c1_i32_4 : i32 to vector<1x128xi32>
    %20 = arith.cmpi eq, %18, %19 : vector<1x128xi32>
    %21 = vector.shape_cast %20 : vector<1x128xi1> to vector<1x128xi1>
    %22 = vector.broadcast %21 : vector<1x128xi1> to vector<32x128xi1>
    %23 = arith.select %22, %14, %13 : vector<32x128xi1>, vector<32x128xf32>
    %c124_i32 = arith.constant 124 : i32
    %24 = tpu.dynamic_rotate %23 by %c124_i32 dim 1 : vector<32x128xf32>, i32 -> vector<32x128xf32>
    %c2_i32 = arith.constant 2 : i32
    %25 = vector.broadcast %c2_i32 : i32 to vector<1x128xi32>
    %26 = arith.shrsi %2, %25 : vector<1x128xi32>
    %c3_i32_5 = arith.constant 3 : i32
    %27 = vector.broadcast %c3_i32_5 : i32 to vector<1x128xi32>
    %28 = arith.andi %26, %27 : vector<1x128xi32>
    %c1_i32_6 = arith.constant 1 : i32
    %29 = vector.broadcast %c1_i32_6 : i32 to vector<1x128xi32>
    %30 = arith.cmpi eq, %28, %29 : vector<1x128xi32>
    %31 = vector.shape_cast %30 : vector<1x128xi1> to vector<1x128xi1>
    %32 = vector.broadcast %31 : vector<1x128xi1> to vector<32x128xi1>
    %33 = arith.select %32, %24, %23 : vector<32x128xi1>, vector<32x128xf32>
    %c120_i32 = arith.constant 120 : i32
    %34 = tpu.dynamic_rotate %33 by %c120_i32 dim 1 : vector<32x128xf32>, i32 -> vector<32x128xf32>
    %c3_i32_7 = arith.constant 3 : i32
    %35 = vector.broadcast %c3_i32_7 : i32 to vector<1x128xi32>
    %36 = arith.shrsi %2, %35 : vector<1x128xi32>
    %c3_i32_8 = arith.constant 3 : i32
    %37 = vector.broadcast %c3_i32_8 : i32 to vector<1x128xi32>
    %38 = arith.andi %36, %37 : vector<1x128xi32>
    %c1_i32_9 = arith.constant 1 : i32
    %39 = vector.broadcast %c1_i32_9 : i32 to vector<1x128xi32>
    %40 = arith.cmpi eq, %38, %39 : vector<1x128xi32>
    %41 = vector.shape_cast %40 : vector<1x128xi1> to vector<1x128xi1>
    %42 = vector.broadcast %41 : vector<1x128xi1> to vector<32x128xi1>
    %43 = arith.select %42, %34, %33 : vector<32x128xi1>, vector<32x128xf32>
    %c112_i32 = arith.constant 112 : i32
    %44 = tpu.dynamic_rotate %43 by %c112_i32 dim 1 : vector<32x128xf32>, i32 -> vector<32x128xf32>
    %c4_i32 = arith.constant 4 : i32
    %45 = vector.broadcast %c4_i32 : i32 to vector<1x128xi32>
    %46 = arith.shrsi %2, %45 : vector<1x128xi32>
    %c3_i32_10 = arith.constant 3 : i32
    %47 = vector.broadcast %c3_i32_10 : i32 to vector<1x128xi32>
    %48 = arith.andi %46, %47 : vector<1x128xi32>
    %c1_i32_11 = arith.constant 1 : i32
    %49 = vector.broadcast %c1_i32_11 : i32 to vector<1x128xi32>
    %50 = arith.cmpi eq, %48, %49 : vector<1x128xi32>
    %51 = vector.shape_cast %50 : vector<1x128xi1> to vector<1x128xi1>
    %52 = vector.broadcast %51 : vector<1x128xi1> to vector<32x128xi1>
    %53 = arith.select %52, %44, %43 : vector<32x128xi1>, vector<32x128xf32>
    %c96_i32 = arith.constant 96 : i32
    %54 = tpu.dynamic_rotate %53 by %c96_i32 dim 1 : vector<32x128xf32>, i32 -> vector<32x128xf32>
    %c5_i32 = arith.constant 5 : i32
    %55 = vector.broadcast %c5_i32 : i32 to vector<1x128xi32>
    %56 = arith.shrsi %2, %55 : vector<1x128xi32>
    %c3_i32_12 = arith.constant 3 : i32
    %57 = vector.broadcast %c3_i32_12 : i32 to vector<1x128xi32>
    %58 = arith.andi %56, %57 : vector<1x128xi32>
    %c1_i32_13 = arith.constant 1 : i32
    %59 = vector.broadcast %c1_i32_13 : i32 to vector<1x128xi32>
    %60 = arith.cmpi eq, %58, %59 : vector<1x128xi32>
    %61 = vector.shape_cast %60 : vector<1x128xi1> to vector<1x128xi1>
    %62 = vector.broadcast %61 : vector<1x128xi1> to vector<32x128xi1>
    %63 = arith.select %62, %54, %53 : vector<32x128xi1>, vector<32x128xf32>
    %64 = vector.extract_strided_slice %0 {offsets = [0, 128], sizes = [32, 128], strides = [1, 1]} : vector<32x256xf32> to vector<32x128xf32>
    %65 = tpu.iota {dimensions = array<i32: 1>} : vector<1x128xi32>
    %c127_i32_14 = arith.constant 127 : i32
    %66 = tpu.dynamic_rotate %64 by %c127_i32_14 dim 1 : vector<32x128xf32>, i32 -> vector<32x128xf32>
    %c127_i32_15 = arith.constant 127 : i32
    %67 = tpu.dynamic_rotate %66 by %c127_i32_15 dim 1 : vector<32x128xf32>, i32 -> vector<32x128xf32>
    %c0_i32_16 = arith.constant 0 : i32
    %68 = vector.broadcast %c0_i32_16 : i32 to vector<1x128xi32>
    %69 = arith.shrsi %65, %68 : vector<1x128xi32>
    %c3_i32_17 = arith.constant 3 : i32
    %70 = vector.broadcast %c3_i32_17 : i32 to vector<1x128xi32>
    %71 = arith.andi %69, %70 : vector<1x128xi32>
    %c1_i32_18 = arith.constant 1 : i32
    %72 = vector.broadcast %c1_i32_18 : i32 to vector<1x128xi32>
    %73 = arith.cmpi eq, %71, %72 : vector<1x128xi32>
    %74 = vector.shape_cast %73 : vector<1x128xi1> to vector<1x128xi1>
    %75 = vector.broadcast %74 : vector<1x128xi1> to vector<32x128xi1>
    %76 = arith.select %75, %67, %66 : vector<32x128xi1>, vector<32x128xf32>
    %c126_i32_19 = arith.constant 126 : i32
    %77 = tpu.dynamic_rotate %76 by %c126_i32_19 dim 1 : vector<32x128xf32>, i32 -> vector<32x128xf32>
    %c1_i32_20 = arith.constant 1 : i32
    %78 = vector.broadcast %c1_i32_20 : i32 to vector<1x128xi32>
    %79 = arith.shrsi %65, %78 : vector<1x128xi32>
    %c3_i32_21 = arith.constant 3 : i32
    %80 = vector.broadcast %c3_i32_21 : i32 to vector<1x128xi32>
    %81 = arith.andi %79, %80 : vector<1x128xi32>
    %c1_i32_22 = arith.constant 1 : i32
    %82 = vector.broadcast %c1_i32_22 : i32 to vector<1x128xi32>
    %83 = arith.cmpi eq, %81, %82 : vector<1x128xi32>
    %84 = vector.shape_cast %83 : vector<1x128xi1> to vector<1x128xi1>
    %85 = vector.broadcast %84 : vector<1x128xi1> to vector<32x128xi1>
    %86 = arith.select %85, %77, %76 : vector<32x128xi1>, vector<32x128xf32>
    %c124_i32_23 = arith.constant 124 : i32
    %87 = tpu.dynamic_rotate %86 by %c124_i32_23 dim 1 : vector<32x128xf32>, i32 -> vector<32x128xf32>
    %c2_i32_24 = arith.constant 2 : i32
    %88 = vector.broadcast %c2_i32_24 : i32 to vector<1x128xi32>
    %89 = arith.shrsi %65, %88 : vector<1x128xi32>
    %c3_i32_25 = arith.constant 3 : i32
    %90 = vector.broadcast %c3_i32_25 : i32 to vector<1x128xi32>
    %91 = arith.andi %89, %90 : vector<1x128xi32>
    %c1_i32_26 = arith.constant 1 : i32
    %92 = vector.broadcast %c1_i32_26 : i32 to vector<1x128xi32>
    %93 = arith.cmpi eq, %91, %92 : vector<1x128xi32>
    %94 = vector.shape_cast %93 : vector<1x128xi1> to vector<1x128xi1>
    %95 = vector.broadcast %94 : vector<1x128xi1> to vector<32x128xi1>
    %96 = arith.select %95, %87, %86 : vector<32x128xi1>, vector<32x128xf32>
    %c120_i32_27 = arith.constant 120 : i32
    %97 = tpu.dynamic_rotate %96 by %c120_i32_27 dim 1 : vector<32x128xf32>, i32 -> vector<32x128xf32>
    %c3_i32_28 = arith.constant 3 : i32
    %98 = vector.broadcast %c3_i32_28 : i32 to vector<1x128xi32>
    %99 = arith.shrsi %65, %98 : vector<1x128xi32>
    %c3_i32_29 = arith.constant 3 : i32
    %100 = vector.broadcast %c3_i32_29 : i32 to vector<1x128xi32>
    %101 = arith.andi %99, %100 : vector<1x128xi32>
    %c1_i32_30 = arith.constant 1 : i32
    %102 = vector.broadcast %c1_i32_30 : i32 to vector<1x128xi32>
    %103 = arith.cmpi eq, %101, %102 : vector<1x128xi32>
    %104 = vector.shape_cast %103 : vector<1x128xi1> to vector<1x128xi1>
    %105 = vector.broadcast %104 : vector<1x128xi1> to vector<32x128xi1>
    %106 = arith.select %105, %97, %96 : vector<32x128xi1>, vector<32x128xf32>
    %c112_i32_31 = arith.constant 112 : i32
    %107 = tpu.dynamic_rotate %106 by %c112_i32_31 dim 1 : vector<32x128xf32>, i32 -> vector<32x128xf32>
    %c4_i32_32 = arith.constant 4 : i32
    %108 = vector.broadcast %c4_i32_32 : i32 to vector<1x128xi32>
    %109 = arith.shrsi %65, %108 : vector<1x128xi32>
    %c3_i32_33 = arith.constant 3 : i32
    %110 = vector.broadcast %c3_i32_33 : i32 to vector<1x128xi32>
    %111 = arith.andi %109, %110 : vector<1x128xi32>
    %c1_i32_34 = arith.constant 1 : i32
    %112 = vector.broadcast %c1_i32_34 : i32 to vector<1x128xi32>
    %113 = arith.cmpi eq, %111, %112 : vector<1x128xi32>
    %114 = vector.shape_cast %113 : vector<1x128xi1> to vector<1x128xi1>
    %115 = vector.broadcast %114 : vector<1x128xi1> to vector<32x128xi1>
    %116 = arith.select %115, %107, %106 : vector<32x128xi1>, vector<32x128xf32>
    %c96_i32_35 = arith.constant 96 : i32
    %117 = tpu.dynamic_rotate %116 by %c96_i32_35 dim 1 : vector<32x128xf32>, i32 -> vector<32x128xf32>
    %c5_i32_36 = arith.constant 5 : i32
    %118 = vector.broadcast %c5_i32_36 : i32 to vector<1x128xi32>
    %119 = arith.shrsi %65, %118 : vector<1x128xi32>
    %c3_i32_37 = arith.constant 3 : i32
    %120 = vector.broadcast %c3_i32_37 : i32 to vector<1x128xi32>
    %121 = arith.andi %119, %120 : vector<1x128xi32>
    %c1_i32_38 = arith.constant 1 : i32
    %122 = vector.broadcast %c1_i32_38 : i32 to vector<1x128xi32>
    %123 = arith.cmpi eq, %121, %122 : vector<1x128xi32>
    %124 = vector.shape_cast %123 : vector<1x128xi1> to vector<1x128xi1>
    %125 = vector.broadcast %124 : vector<1x128xi1> to vector<32x128xi1>
    %126 = arith.select %125, %117, %116 : vector<32x128xi1>, vector<32x128xf32>
    %127 = tpu.iota {dimensions = array<i32: 1>} : vector<1x128xi32>
    %c64_i32 = arith.constant 64 : i32
    %128 = vector.broadcast %c64_i32 : i32 to vector<1x128xi32>
    %129 = arith.cmpi slt, %127, %128 : vector<1x128xi32>
    %c64_i32_39 = arith.constant 64 : i32
    %130 = tpu.dynamic_rotate %126 by %c64_i32_39 dim 1 : vector<32x128xf32>, i32 -> vector<32x128xf32>
    %131 = vector.shape_cast %129 : vector<1x128xi1> to vector<1x128xi1>
    %132 = vector.broadcast %131 : vector<1x128xi1> to vector<32x128xi1>
    %133 = arith.select %132, %63, %130 : vector<32x128xi1>, vector<32x128xf32>
    %c0_40 = arith.constant 0 : index
    %c0_41 = arith.constant 0 : index
    %134 = vector.load %arg2[%c0_40, %c0_41] : memref<32x128xf32, #tpu.memory_space<vmem>>, vector<32x128xf32>
    tpu.vector_store %arg2[%c0_40, %c0_41], %133 {strides = array<i32>} : memref<32x128xf32, #tpu.memory_space<vmem>>, vector<32x128xf32>,
    return
  }
  func.func @transform_0(%arg0: i32) -> (i32, i32) {
    %c0_i32 = arith.constant 0 : i32
    %c0_i32_0 = arith.constant 0 : i32
    return %arg0, %c0_i32 : i32, i32
  }
  func.func @transform_1(%arg0: i32) -> (i32, i32) {
    %c0_i32 = arith.constant 0 : i32
    %c0_i32_0 = arith.constant 0 : i32
    return %arg0, %c0_i32 : i32, i32
  }
}

</mosaic_0001>

<bundles_post_ra>
// kernel: tpu_custom_call.1
= control target key start
LH: loop header
LB: loop body
LE: loop exit
PB: predicated region body
PF: predicated region fallthrough
CT: control target
= control target key end

     0   :  { %6 = vsyncpa [#allocation3], 0  ;;  %s443_s0 = inlined_call_operand.hbm [shape: f32[32,256], index: 0, kind: input, shape index: {}]   ;;  %s444_s1 = inlined_call_operand.hbm [shape: f32[32,128], index: 1, kind: output, shape index: {}]  }
   0x1   :  { %7 = vsyncpa [#allocation4], 0  ;;  %s319_s6 = smov [#allocation2]   ;;  %s271_s10 = scalar_lea.hbm %s443_s0, 1024 }
   0x2   :  { %s13_s7 = sshll.u32 %s319_s6, 4  ;;  %p272_p0 = scmp.ne.s32.totalorder %s443_s0, %s271_s10  ;;  %s14_s7 = int_to_ptr.vmem [resolvable:$true] %s13_s7 }
   0x3   :  { %p275_p1 = scmp.lt.u32.totalorder %s271_s10, %s443_s0 }
   0x5   :  { %p277_p2 = pnand %p275_p1, %p272_p0 }
   0x7   :  { %280 = shalt.err (!%p277_p2)
}
   0x8   :  { %s281_s15 = scalar_lea.vmem %s14_s7, 1024  ;;  %p286_p4 = scmp.lt.s32.totalorder %s14_s7, %s14_s7 }
   0x9   :  { %p282_p3 = scmp.ne.s32.totalorder %s14_s7, %s281_s15  ;;  %p287_p5 = scmp.lt.s32.totalorder %s281_s15, %s281_s15 }
   0xb   :  { %p288_p6 = por %p287_p5, %p286_p4 }
   0xd   :  { %p289_p7 = pnand %p288_p6, %p282_p3 }
   0xf   :  { %292 = shalt.err (!%p289_p7)
}
  0x10   :  { %s320_s16 = smov 256   ;;  %s321_s17 = smov 16  }
  0x11   :  { %19 = dma.hbm_to_vmem [thread:$0]  %s443_s0, 1024, %s14_s7, [#allocation3], %s320_s16, %s320_s16, %s321_s17  }
  0x12   :  { %315 = dma.done.wait [#allocation3], 1024  }
  0x13   :  { %316 = vsyncadd [#allocation3], 4294966272  ;;  %v24_v0 = vld [vmem:[#allocation2 + $0x8] sm:$0xff]  ;;  %s322_s20 = smov 127   ;;  %v26_v2 = vld [vmem:[#allocation2 + $0x18] sm:$0xff]  ;;  %v31_v16 = vlaneseq  ;;  %s323_s0 = smov 126  }
  0x14   :  { %v28_v1 = vld [vmem:[#allocation2 + $0x28] sm:$0xff]  ;;  %142 = vrot.lane.b32.xlu0 %v24_v0, %s322_s20  ;;  %v30_v3 = vld [vmem:[#allocation2 + $0x38] sm:$0xff]  ;;  %v23_v4 = vld [vmem:[#allocation2] sm:$0xff]  ;;  %s324_s21 = smov 124   ;;  %s325_s22 = smov 120  }
  0x15   :  { %146 = vrot.lane.b32.xlu1 %v28_v1, %s322_s20  ;;  %v25_v5 = vld [vmem:[#allocation2 + $0x10] sm:$0xff]  ;;  %v27_v6 = vld [vmem:[#allocation2 + $0x20] sm:$0xff]  ;;  %v354_v17 = vand.u32 127, %v31_v16  ;;  %s326_s23 = smov 112   ;;  %s327_s24 = smov 96  }
  0x16   :  { %v29_v7 = vld [vmem:[#allocation2 + $0x30] sm:$0xff]  ;;  %s328_s25 = smov 64   ;;  %s329_s26 = smov [#allocation5]  }
  0x17   :  { %v49_v18 = vand.u32 3, %v354_v17  ;;  %v65_v36 = vshra.s32 %v354_v17, 1  ;;  %v82_v54 = vshra.s32 %v354_v17, 2  ;;  %vm222_vm6 = vcmp.lt.s32.totalorder %v354_v17, 64  ;;  %s246_s27 = sshll.u32 %s329_s26, 4  ;;  %s247_s27 = int_to_ptr.vmem [resolvable:$true] %s246_s27 }
  0x18   :  { %144 = vrot.lane.b32.xlu0 %v26_v2, %s322_s20  ;;  %s293_s28 = scalar_lea.vmem %s247_s27, 512  ;;  %p298_p9 = scmp.lt.s32.totalorder %s247_s27, %s247_s27 }
  0x19   :  { %148 = vrot.lane.b32.xlu1 %v30_v3, %s322_s20  ;;  %vm357_vm0 = vcmp.eq.s32.totalorder %v49_v18, 1  ;;  %v66_v37 = vand.u32 3, %v65_v36  ;;  %v83_v55 = vand.u32 3, %v82_v54  ;;  %p294_p8 = scmp.ne.s32.totalorder %s247_s27, %s293_s28  ;;  %p299_p10 = scmp.lt.s32.totalorder %s293_s28, %s293_s28 }
  0x1b   :  { %vm67_vm1 = vcmp.eq.s32.totalorder %v66_v37, 1  ;;  %vm84_vm2 = vcmp.eq.s32.totalorder %v83_v55, 1  ;;  %p300_p11 = por %p299_p10, %p298_p9 }
  0x1c   :  { %33 = vrot.lane.b32.xlu0 %v23_v4, %s322_s20 }
  0x1d   :  { %35 = vrot.lane.b32.xlu1 %v25_v5, %s322_s20  ;;  %p301_p12 = pnand %p300_p11, %p294_p8 }
  0x20   :  { %37 = vrot.lane.b32.xlu0 %v27_v6, %s322_s20 }
  0x21   :  { %39 = vrot.lane.b32.xlu1 %v29_v7, %s322_s20 }
  0x86   :  { %v143_v8 = vpop.permute.xlu0 %142 }
  0x87   :  { %v147_v9 = vpop.permute.xlu1 %146  ;;  %150 = vrot.lane.b32.xlu0 %v143_v8, %s322_s20 }
  0x8a   :  { %v145_v10 = vpop.permute.xlu0 %144 }
  0x8b   :  { %v149_v11 = vpop.permute.xlu1 %148  ;;  %152 = vrot.lane.b32.xlu1 %v145_v10, %s322_s20  ;;  %154 = vrot.lane.b32.xlu0 %v147_v9, %s322_s20 }
  0x8e   :  { %v34_v12 = vpop.permute.xlu0 %33 }
  0x8f   :  { %v36_v13 = vpop.permute.xlu1 %35  ;;  %156 = vrot.lane.b32.xlu1 %v149_v11, %s322_s20  ;;  %41 = vrot.lane.b32.xlu0 %v34_v12, %s322_s20 }
  0x92   :  { %v38_v14 = vpop.permute.xlu0 %37 }
  0x93   :  { %43 = vrot.lane.b32.xlu1 %v36_v13, %s322_s20  ;;  %45 = vrot.lane.b32.xlu0 %v38_v14, %s322_s20  ;;  %v40_v15 = vpop.permute.xlu1 %39 }
  0x97   :  { %47 = vrot.lane.b32.xlu1 %v40_v15, %s322_s20 }
  0xf9   :  { %v151_v20 = vpop.permute.xlu0 %150 }
  0xfa   :  { %v158_v21 = vsel %vm357_vm0, %v151_v20, %v143_v8  ;;  %v99_v8 = vshra.s32 %v354_v17, 3 }
  0xfb   :  { %162 = vrot.lane.b32.xlu0 %v158_v21, %s323_s0 }
  0xfd   :  { %v153_v22 = vpop.permute.xlu1 %152  ;;  %v155_v23 = vpop.permute.xlu0 %154 }
  0xfe   :  { %v159_v24 = vsel %vm357_vm0, %v153_v22, %v145_v10  ;;  %v160_v25 = vsel %vm357_vm0, %v155_v23, %v147_v9  ;;  %v100_v9 = vand.u32 3, %v99_v8 }
  0xff   :  { %164 = vrot.lane.b32.xlu1 %v159_v24, %s323_s0  ;;  %166 = vrot.lane.b32.xlu0 %v160_v25, %s323_s0 }
 0x100   :  { %vm101_vm3 = vcmp.eq.s32.totalorder %v100_v9, 1 }
 0x101   :  { %v157_v26 = vpop.permute.xlu1 %156  ;;  %v42_v27 = vpop.permute.xlu0 %41 }
 0x102   :  { %v161_v28 = vsel %vm357_vm0, %v157_v26, %v149_v11  ;;  %v53_v29 = vsel %vm357_vm0, %v42_v27, %v34_v12  ;;  %v116_v27 = vshra.s32 %v354_v17, 4 }
 0x103   :  { %168 = vrot.lane.b32.xlu1 %v161_v28, %s323_s0  ;;  %57 = vrot.lane.b32.xlu0 %v53_v29, %s323_s0 }
 0x105   :  { %v44_v30 = vpop.permute.xlu1 %43  ;;  %v46_v31 = vpop.permute.xlu0 %45 }
 0x106   :  { %v54_v32 = vsel %vm357_vm0, %v44_v30, %v36_v13  ;;  %v55_v33 = vsel %vm357_vm0, %v46_v31, %v38_v14 }
 0x107   :  { %59 = vrot.lane.b32.xlu1 %v54_v32, %s323_s0  ;;  %61 = vrot.lane.b32.xlu0 %v55_v33, %s323_s0 }
 0x109   :  { %v48_v34 = vpop.permute.xlu1 %47 }
 0x10a   :  { %v56_v35 = vsel %vm357_vm0, %v48_v34, %v40_v15 }
 0x10b   :  { %63 = vrot.lane.b32.xlu1 %v56_v35, %s323_s0 }
 0x16d   :  { %v163_v38 = vpop.permute.xlu0 %162 }
 0x16e   :  { %v170_v39 = vsel %vm67_vm1, %v163_v38, %v158_v21 }
 0x16f   :  { %174 = vrot.lane.b32.xlu0 %v170_v39, %s324_s21 }
 0x171   :  { %v165_v40 = vpop.permute.xlu1 %164  ;;  %v167_v41 = vpop.permute.xlu0 %166 }
 0x172   :  { %v171_v42 = vsel %vm67_vm1, %v165_v40, %v159_v24  ;;  %v172_v43 = vsel %vm67_vm1, %v167_v41, %v160_v25 }
 0x173   :  { %176 = vrot.lane.b32.xlu1 %v171_v42, %s324_s21  ;;  %178 = vrot.lane.b32.xlu0 %v172_v43, %s324_s21 }
 0x175   :  { %v169_v44 = vpop.permute.xlu1 %168  ;;  %v58_v45 = vpop.permute.xlu0 %57 }
 0x176   :  { %v173_v46 = vsel %vm67_vm1, %v169_v44, %v161_v28  ;;  %v70_v47 = vsel %vm67_vm1, %v58_v45, %v53_v29  ;;  %v117_v28 = vand.u32 3, %v116_v27  ;;  %v133_v45 = vshra.s32 %v354_v17, 5 }
 0x177   :  { %180 = vrot.lane.b32.xlu1 %v173_v46, %s324_s21  ;;  %74 = vrot.lane.b32.xlu0 %v70_v47, %s324_s21 }
 0x178   :  { %vm118_vm4 = vcmp.eq.s32.totalorder %v117_v28, 1 }
 0x179   :  { %v60_v48 = vpop.permute.xlu1 %59  ;;  %v62_v49 = vpop.permute.xlu0 %61 }
 0x17a   :  { %v71_v50 = vsel %vm67_vm1, %v60_v48, %v54_v32  ;;  %v72_v51 = vsel %vm67_vm1, %v62_v49, %v55_v33 }
 0x17b   :  { %76 = vrot.lane.b32.xlu1 %v71_v50, %s324_s21  ;;  %78 = vrot.lane.b32.xlu0 %v72_v51, %s324_s21 }
 0x17d   :  { %v64_v52 = vpop.permute.xlu1 %63 }
 0x17e   :  { %v73_v53 = vsel %vm67_vm1, %v64_v52, %v56_v35 }
 0x17f   :  { %80 = vrot.lane.b32.xlu1 %v73_v53, %s324_s21 }
 0x1e1   :  { %v175_v56 = vpop.permute.xlu0 %174 }
 0x1e2   :  { %v182_v57 = vsel %vm84_vm2, %v175_v56, %v170_v39 }
 0x1e3   :  { %186 = vrot.lane.b32.xlu0 %v182_v57, %s325_s22 }
 0x1e5   :  { %v177_v58 = vpop.permute.xlu1 %176  ;;  %v179_v59 = vpop.permute.xlu0 %178 }
 0x1e6   :  { %v183_v60 = vsel %vm84_vm2, %v177_v58, %v171_v42  ;;  %v184_v61 = vsel %vm84_vm2, %v179_v59, %v172_v43 }
 0x1e7   :  { %188 = vrot.lane.b32.xlu1 %v183_v60, %s325_s22  ;;  %190 = vrot.lane.b32.xlu0 %v184_v61, %s325_s22 }
 0x1e9   :  { %v181_v62 = vpop.permute.xlu1 %180  ;;  %v75_v63 = vpop.permute.xlu0 %74 }
 0x1ea   :  { %v185_v0 = vsel %vm84_vm2, %v181_v62, %v173_v46  ;;  %v87_v1 = vsel %vm84_vm2, %v75_v63, %v70_v47  ;;  %v134_v46 = vand.u32 3, %v133_v45 }
 0x1eb   :  { %192 = vrot.lane.b32.xlu1 %v185_v0, %s325_s22  ;;  %91 = vrot.lane.b32.xlu0 %v87_v1, %s325_s22 }
 0x1ec   :  { %vm135_vm5 = vcmp.eq.s32.totalorder %v134_v46, 1 }
 0x1ed   :  { %v77_v2 = vpop.permute.xlu1 %76  ;;  %v79_v3 = vpop.permute.xlu0 %78 }
 0x1ee   :  { %v88_v4 = vsel %vm84_vm2, %v77_v2, %v71_v50  ;;  %v89_v5 = vsel %vm84_vm2, %v79_v3, %v72_v51 }
 0x1ef   :  { %93 = vrot.lane.b32.xlu1 %v88_v4, %s325_s22  ;;  %95 = vrot.lane.b32.xlu0 %v89_v5, %s325_s22 }
 0x1f1   :  { %v81_v6 = vpop.permute.xlu1 %80 }
 0x1f2   :  { %v90_v7 = vsel %vm84_vm2, %v81_v6, %v73_v53 }
 0x1f3   :  { %97 = vrot.lane.b32.xlu1 %v90_v7, %s325_s22 }
 0x255   :  { %v187_v10 = vpop.permute.xlu0 %186 }
 0x256   :  { %v194_v11 = vsel %vm101_vm3, %v187_v10, %v182_v57 }
 0x257   :  { %198 = vrot.lane.b32.xlu0 %v194_v11, %s326_s23 }
 0x259   :  { %v189_v12 = vpop.permute.xlu1 %188  ;;  %v191_v13 = vpop.permute.xlu0 %190 }
 0x25a   :  { %v195_v14 = vsel %vm101_vm3, %v189_v12, %v183_v60  ;;  %v196_v15 = vsel %vm101_vm3, %v191_v13, %v184_v61 }
 0x25b   :  { %200 = vrot.lane.b32.xlu1 %v195_v14, %s326_s23  ;;  %202 = vrot.lane.b32.xlu0 %v196_v15, %s326_s23 }
 0x25d   :  { %v193_v16 = vpop.permute.xlu1 %192  ;;  %v92_v18 = vpop.permute.xlu0 %91 }
 0x25e   :  { %v197_v19 = vsel %vm101_vm3, %v193_v16, %v185_v0  ;;  %v104_v20 = vsel %vm101_vm3, %v92_v18, %v87_v1 }
 0x25f   :  { %204 = vrot.lane.b32.xlu1 %v197_v19, %s326_s23  ;;  %108 = vrot.lane.b32.xlu0 %v104_v20, %s326_s23 }
 0x261   :  { %v94_v21 = vpop.permute.xlu1 %93  ;;  %v96_v22 = vpop.permute.xlu0 %95 }
 0x262   :  { %v105_v23 = vsel %vm101_vm3, %v94_v21, %v88_v4  ;;  %v106_v24 = vsel %vm101_vm3, %v96_v22, %v89_v5 }
 0x263   :  { %110 = vrot.lane.b32.xlu1 %v105_v23, %s326_s23  ;;  %112 = vrot.lane.b32.xlu0 %v106_v24, %s326_s23 }
 0x265   :  { %v98_v25 = vpop.permute.xlu1 %97 }
 0x266   :  { %v107_v26 = vsel %vm101_vm3, %v98_v25, %v90_v7 }
 0x267   :  { %114 = vrot.lane.b32.xlu1 %v107_v26, %s326_s23 }
 0x2c9   :  { %v199_v29 = vpop.permute.xlu0 %198 }
 0x2ca   :  { %v206_v30 = vsel %vm118_vm4, %v199_v29, %v194_v11 }
 0x2cb   :  { %210 = vrot.lane.b32.xlu0 %v206_v30, %s327_s24 }
 0x2cd   :  { %v201_v31 = vpop.permute.xlu1 %200  ;;  %v203_v32 = vpop.permute.xlu0 %202 }
 0x2ce   :  { %v207_v33 = vsel %vm118_vm4, %v201_v31, %v195_v14  ;;  %v208_v34 = vsel %vm118_vm4, %v203_v32, %v196_v15 }
 0x2cf   :  { %212 = vrot.lane.b32.xlu1 %v207_v33, %s327_s24  ;;  %214 = vrot.lane.b32.xlu0 %v208_v34, %s327_s24 }
 0x2d1   :  { %v205_v35 = vpop.permute.xlu1 %204  ;;  %v109_v36 = vpop.permute.xlu0 %108 }
 0x2d2   :  { %v209_v37 = vsel %vm118_vm4, %v205_v35, %v197_v19  ;;  %v121_v38 = vsel %vm118_vm4, %v109_v36, %v104_v20 }
 0x2d3   :  { %216 = vrot.lane.b32.xlu1 %v209_v37, %s327_s24  ;;  %125 = vrot.lane.b32.xlu0 %v121_v38, %s327_s24 }
 0x2d5   :  { %v111_v39 = vpop.permute.xlu1 %110  ;;  %v113_v40 = vpop.permute.xlu0 %112 }
 0x2d6   :  { %v122_v41 = vsel %vm118_vm4, %v111_v39, %v105_v23  ;;  %v123_v42 = vsel %vm118_vm4, %v113_v40, %v106_v24 }
 0x2d7   :  { %127 = vrot.lane.b32.xlu1 %v122_v41, %s327_s24  ;;  %129 = vrot.lane.b32.xlu0 %v123_v42, %s327_s24 }
 0x2d9   :  { %v115_v43 = vpop.permute.xlu1 %114 }
 0x2da   :  { %v124_v44 = vsel %vm118_vm4, %v115_v43, %v107_v26 }
 0x2db   :  { %131 = vrot.lane.b32.xlu1 %v124_v44, %s327_s24 }
 0x33d   :  { %v211_v47 = vpop.permute.xlu0 %210 }
 0x33e   :  { %v218_v48 = vsel %vm135_vm5, %v211_v47, %v206_v30 }
 0x33f   :  { %223 = vrot.lane.b32.xlu0 %v218_v48, %s328_s25 }
 0x341   :  { %v213_v49 = vpop.permute.xlu1 %212  ;;  %v215_v50 = vpop.permute.xlu0 %214 }
 0x342   :  { %v219_v51 = vsel %vm135_vm5, %v213_v49, %v207_v33  ;;  %v220_v52 = vsel %vm135_vm5, %v215_v50, %v208_v34 }
 0x343   :  { %225 = vrot.lane.b32.xlu1 %v219_v51, %s328_s25  ;;  %227 = vrot.lane.b32.xlu0 %v220_v52, %s328_s25 }
 0x345   :  { %v217_v53 = vpop.permute.xlu1 %216  ;;  %v126_v55 = vpop.permute.xlu0 %125 }
 0x346   :  { %v221_v54 = vsel %vm135_vm5, %v217_v53, %v209_v37  ;;  %v138_v58 = vsel %vm135_vm5, %v126_v55, %v121_v38 }
 0x347   :  { %229 = vrot.lane.b32.xlu1 %v221_v54, %s328_s25 }
 0x349   :  { %v128_v56 = vpop.permute.xlu1 %127  ;;  %v130_v57 = vpop.permute.xlu0 %129 }
 0x34a   :  { %v139_v62 = vsel %vm135_vm5, %v128_v56, %v122_v41  ;;  %v140_v63 = vsel %vm135_vm5, %v130_v57, %v123_v42 }
 0x34d   :  { %v132_v59 = vpop.permute.xlu1 %131 }
 0x34e   :  { %v141_v4 = vsel %vm135_vm5, %v132_v59, %v124_v44 }
 0x3b1   :  { %v224_v60 = vpop.permute.xlu0 %223 }
 0x3b2   :  { %v233_v61 = vsel %vm222_vm6, %v138_v58, %v224_v60 }
 0x3b3   :  { %237 = vst [vmem:[#allocation5] sm:$0xff] %v233_v61 }
 0x3b5   :  { %v226_v0 = vpop.permute.xlu1 %225  ;;  %v228_v1 = vpop.permute.xlu0 %227 }
 0x3b6   :  { %v234_v2 = vsel %vm222_vm6, %v139_v62, %v226_v0  ;;  %v235_v3 = vsel %vm222_vm6, %v140_v63, %v228_v1 }
 0x3b7   :  { %238 = vst [vmem:[#allocation5 + $0x8] sm:$0xff] %v234_v2  ;;  %239 = vst [vmem:[#allocation5 + $0x10] sm:$0xff] %v235_v3 }
 0x3b9   :  { %v230_v5 = vpop.permute.xlu1 %229 }
 0x3ba   :  { %v236_v6 = vsel %vm222_vm6, %v141_v4, %v230_v5 }
 0x3bb   :  { %240 = vst [vmem:[#allocation5 + $0x18] sm:$0xff] %v236_v6 }
 0x3bc   :  { %304 = shalt.err (!%p301_p12)
}
 0x3bd   :  { %s305_s2 = scalar_lea.hbm %s444_s1, 512 }
 0x3be   :  { %p306_p13 = scmp.ne.s32.totalorder %s444_s1, %s305_s2  ;;  %p309_p0 = scmp.lt.u32.totalorder %s305_s2, %s444_s1 }
 0x3c0   :  { %p311_p1 = pnand %p309_p0, %p306_p13 }
 0x3c2   :  { %314 = shalt.err (!%p311_p1)
}
 0x3c3   :  { %s330_s7 = smov 128   ;;  %s331_s8 = smov 8  }
 0x3c4   :  { %252 = dma.vmem_to_hbm [thread:$0]  %s247_s27, 512, %s444_s1, [#allocation4], %s330_s7, %s330_s7, %s331_s8  }
 0x3c5   :  { %317 = dma.done.wait [#allocation4], 512  }
 0x3c6   :  { %318 = vsyncadd [#allocation4], 4294966784 }
 0x3c7   :  { %256 = vsyncpa [#allocation3], 1 }
 0x3c8   :  { %257 = vsyncpa [#allocation4], 1 }

</bundles_post_ra>
